<compile_context>
chip_gen: v6e
topology: v6e:2x2x1
jax: 0.10.0
libtpu: 0.0.40
codegen_flags: <defaults>
</compile_context>

<pallas_src>
import functools

import jax
import jax.numpy as jnp
from jax.experimental import pallas as pl
from jax.experimental.pallas import tpu as pltpu

LANE = 128   # TPU lane width; also the padded hidden/output width
H1 = 64      # fc1 output features
H2 = 32      # fc2 output features


def _round_up(x, m):
    return (x + m - 1) // m * m


def _param_layout(dim_state):
    """Row offsets of each segment inside the packed (total, 128) param slab.

    Every segment starts on an 8-row (sublane) boundary so the in-kernel
    static slices are tile-aligned.
    """
    s_pad = _round_up(max(dim_state, 1), 8)
    o_w1 = 0                 # (s_pad, 128)  w1 padded from (dim_state, 64)
    o_b1 = o_w1 + s_pad      # 8 rows, only row 0 used
    o_w2 = o_b1 + 8          # (128, 128)    w2 padded from (64, 32)
    o_b2 = o_w2 + LANE       # 8 rows
    o_w3 = o_b2 + 8          # (128, 128)    w3 padded from (32, dim_action)
    o_b3 = o_w3 + LANE       # 8 rows
    total = o_b3 + 8
    return s_pad, o_w1, o_b1, o_w2, o_b2, o_w3, o_b3, total


def pack_params(w1, b1, w2, b2, w3, b3):
    """Pack all layer params into one zero-padded (total, 128) f32 array.

    Weights are stored as (in, out) so the kernel computes x @ W + b, which
    matches PyTorch Linear (x @ W.T + b with W=(out,in)).  Zero padding keeps
    the padded lanes of every hidden activation exactly zero, so the widened
    128-wide matmuls are numerically identical to the narrow ones.
    """
    dim_state = w1.shape[0]
    dim_action = w3.shape[1]
    s_pad, o_w1, o_b1, o_w2, o_b2, o_w3, o_b3, total = _param_layout(dim_state)

    p = jnp.zeros((total, LANE), jnp.float32)
    p = p.at[o_w1:o_w1 + dim_state, :H1].set(w1.astype(jnp.float32))
    p = p.at[o_b1, :H1].set(b1.reshape(-1).astype(jnp.float32))
    p = p.at[o_w2:o_w2 + H1, :H2].set(w2.astype(jnp.float32))
    p = p.at[o_b2, :H2].set(b2.reshape(-1).astype(jnp.float32))
    p = p.at[o_w3:o_w3 + H2, :dim_action].set(w3.astype(jnp.float32))
    p = p.at[o_b3, :dim_action].set(b3.reshape(-1).astype(jnp.float32))
    return p


def _policy_kernel(state_ref, params_ref, out_ref, *,
                   max_action, s_pad, o_w1, o_b1, o_w2, o_b2, o_w3, o_b3):
    x = state_ref[...]                                       # (TB, s_pad) f32

    # fc1 + ReLU -> (TB, 128); padded lanes stay exactly 0 (zero W cols/bias)
    w1 = params_ref[o_w1:o_w1 + s_pad, :]
    b1 = params_ref[o_b1:o_b1 + 1, :]
    h1 = jnp.maximum(
        jnp.dot(x, w1, preferred_element_type=jnp.float32) + b1, 0.0)

    # fc2 + ReLU -> (TB, 128)
    w2 = params_ref[o_w2:o_w2 + LANE, :]
    b2 = params_ref[o_b2:o_b2 + 1, :]
    h2 = jnp.maximum(
        jnp.dot(h1, w2, preferred_element_type=jnp.float32) + b2, 0.0)

    # fc3 + tanh, scaled by baked-in max_action -> lane-dense (TB, 128) store
    w3 = params_ref[o_w3:o_w3 + LANE, :]
    b3 = params_ref[o_b3:o_b3 + 1, :]
    h3 = jnp.dot(h2, w3, preferred_element_type=jnp.float32) + b3
    out_ref[...] = (max_action * jnp.tanh(h3)).astype(out_ref.dtype)


def policy_net_forward(state, w1, b1, w2, b2, w3, b3, max_action,
                       *, tile_b=512):
    B, dim_state = state.shape
    dim_action = w3.shape[1]
    s_pad, o_w1, o_b1, o_w2, o_b2, o_w3, o_b3, total = _param_layout(dim_state)

    packed = pack_params(w1, b1, w2, b2, w3, b3)

    # Batch tile: multiple of 8 sublanes, capped so large batches stream
    # through the (auto-double-buffered) pipeline instead of one giant block.
    tb = min(int(tile_b), _round_up(B, 8))
    b_pad = _round_up(B, tb)

    if b_pad == B and s_pad == dim_state:
        state_p = state.astype(jnp.float32)
    else:
        state_p = jnp.zeros((b_pad, s_pad), jnp.float32)
        state_p = state_p.at[:B, :dim_state].set(state.astype(jnp.float32))

    kernel = functools.partial(
        _policy_kernel, max_action=float(max_action), s_pad=s_pad,
        o_w1=o_w1, o_b1=o_b1, o_w2=o_w2, o_b2=o_b2, o_w3=o_w3, o_b3=o_b3)

    flops = 2 * b_pad * (s_pad * LANE + LANE * LANE + LANE * LANE)
    bytes_accessed = 4 * (state_p.size + packed.size + b_pad * LANE)

    out_padded = pl.pallas_call(
        kernel,
        out_shape=jax.ShapeDtypeStruct((b_pad, LANE), jnp.float32),
        grid=(b_pad // tb,),
        in_specs=[
            pl.BlockSpec((tb, s_pad), lambda i: (i, 0)),       # state tile
            pl.BlockSpec((total, LANE), lambda i: (0, 0)),     # resident params
        ],
        out_specs=pl.BlockSpec((tb, LANE), lambda i: (i, 0)),  # lane-dense out
        compiler_params=pltpu.CompilerParams(
            dimension_semantics=("parallel",)),                # v7x: both TCs
        cost_estimate=pl.CostEstimate(
            flops=flops,
            transcendentals=b_pad * LANE,
            bytes_accessed=bytes_accessed),
    )(state_p, packed)

    return out_padded[:B, :dim_action]


def init_params(key, dim_state, dim_action):
    """Deterministic init mimicking PyTorch Linear default (U(+-1/sqrt(fan_in)))."""
    ks = jax.random.split(key, 6)

    def linear(kw, kb, fan_in, fan_out):
        bound = 1.0 / jnp.sqrt(jnp.float32(fan_in))
        w = jax.random.uniform(kw, (fan_in, fan_out), jnp.float32, -bound, bound)
        b = jax.random.uniform(kb, (fan_out,), jnp.float32, -bound, bound)
        return w, b

    w1, b1 = linear(ks[0], ks[1], dim_state, H1)
    w2, b2 = linear(ks[2], ks[3], H1, H2)
    w3, b3 = linear(ks[4], ks[5], H2, dim_action)
    return w1, b1, w2, b2, w3, b3


def reference_forward(state, w1, b1, w2, b2, w3, b3, max_action):
    h1 = jnp.maximum(state @ w1 + b1, 0.0)
    h2 = jnp.maximum(h1 @ w2 + b2, 0.0)
    return max_action * jnp.tanh(h2 @ w3 + b3)


if __name__ == "__main__":
    key = jax.random.PRNGKey(0)
    k_state, k_params = jax.random.split(key)

    B = 8            # batch
    dim_state = 16   # observation dimension
    dim_action = 4   # action dimension
    max_action = 2.0

    state = jax.random.normal(k_state, (B, dim_state), dtype=jnp.float32)
    params = init_params(k_params, dim_state, dim_action)

    out = policy_net_forward(state, *params, max_action)
    out = jax.block_until_ready(out)

    ref = reference_forward(state, *params, max_action)
    assert out.shape == (B, dim_action)
    assert jnp.allclose(out, ref, atol=1e-5, rtol=1e-5), "mismatch vs JAX reference"

    print("KERNEL_OK")
</pallas_src>

<mosaic_0001>
module attributes {stable_mosaic.version = 11 : i64} {
  func.func @_policy_kernel(%arg0: i32, %arg1: memref<8x16xf32, #tpu.memory_space<vmem>>, %arg2: memref<296x128xf32, #tpu.memory_space<vmem>>, %arg3: memref<8x128xf32, #tpu.memory_space<vmem>>) attributes {dimension_semantics = [#tpu.dimension_semantics<parallel>], iteration_bounds = array<i64: 1>, scalar_prefetch = 0 : i64, scratch_operands = 0 : i64, tpu.core_type = #tpu.core_type<tc>, window_params = [{transform_indices = @transform_0, window_bounds = array<i64: 8, 16>}, {pipeline_mode = #tpu.pipeline_mode<synchronous>, transform_indices = @transform_1, window_bounds = array<i64: 296, 128>}, {transform_indices = @transform_2, window_bounds = array<i64: 8, 128>}]} {
    %c0 = arith.constant 0 : index
    %c0_0 = arith.constant 0 : index
    %0 = vector.load %arg1[%c0, %c0_0] : memref<8x16xf32, #tpu.memory_space<vmem>>, vector<8x16xf32>
    %c0_1 = arith.constant 0 : index
    %c0_2 = arith.constant 0 : index
    %1 = vector.load %arg2[%c0_1, %c0_2] : memref<296x128xf32, #tpu.memory_space<vmem>>, vector<16x128xf32>
    %c16 = arith.constant 16 : index
    %c0_3 = arith.constant 0 : index
    %2 = vector.load %arg2[%c16, %c0_3] : memref<296x128xf32, #tpu.memory_space<vmem>>, vector<1x128xf32>
    %cst = arith.constant dense<0.000000e+00> : vector<8x128xf32>
    %3 = tpu.matmul %0, %1, %cst {dimension_numbers = #tpu.dot_dimension_numbers<[1], [0], [0], [1], [0, 0, 1, 1], [], []>} : vector<8x16xf32>, vector<16x128xf32>, vector<8x128xf32> -> vector<8x128xf32>
    %4 = vector.broadcast %2 : vector<1x128xf32> to vector<8x128xf32>
    %5 = arith.addf %3, %4 : vector<8x128xf32>
    %cst_4 = arith.constant 0.000000e+00 : f32
    %6 = vector.broadcast %cst_4 : f32 to vector<8x128xf32>
    %7 = arith.maximumf %5, %6 : vector<8x128xf32>
    %c24 = arith.constant 24 : index
    %c0_5 = arith.constant 0 : index
    %8 = vector.load %arg2[%c24, %c0_5] : memref<296x128xf32, #tpu.memory_space<vmem>>, vector<128x128xf32>
    %c152 = arith.constant 152 : index
    %c0_6 = arith.constant 0 : index
    %9 = vector.load %arg2[%c152, %c0_6] : memref<296x128xf32, #tpu.memory_space<vmem>>, vector<1x128xf32>
    %cst_7 = arith.constant dense<0.000000e+00> : vector<8x128xf32>
    %10 = tpu.matmul %7, %8, %cst_7 {dimension_numbers = #tpu.dot_dimension_numbers<[1], [0], [0], [1], [0, 0, 1, 1], [], []>} : vector<8x128xf32>, vector<128x128xf32>, vector<8x128xf32> -> vector<8x128xf32>
    %11 = vector.broadcast %9 : vector<1x128xf32> to vector<8x128xf32>
    %12 = arith.addf %10, %11 : vector<8x128xf32>
    %cst_8 = arith.constant 0.000000e+00 : f32
    %13 = vector.broadcast %cst_8 : f32 to vector<8x128xf32>
    %14 = arith.maximumf %12, %13 : vector<8x128xf32>
    %c160 = arith.constant 160 : index
    %c0_9 = arith.constant 0 : index
    %15 = vector.load %arg2[%c160, %c0_9] : memref<296x128xf32, #tpu.memory_space<vmem>>, vector<128x128xf32>
    %c288 = arith.constant 288 : index
    %c0_10 = arith.constant 0 : index
    %16 = vector.load %arg2[%c288, %c0_10] : memref<296x128xf32, #tpu.memory_space<vmem>>, vector<1x128xf32>
    %cst_11 = arith.constant dense<0.000000e+00> : vector<8x128xf32>
    %17 = tpu.matmul %14, %15, %cst_11 {dimension_numbers = #tpu.dot_dimension_numbers<[1], [0], [0], [1], [0, 0, 1, 1], [], []>} : vector<8x128xf32>, vector<128x128xf32>, vector<8x128xf32> -> vector<8x128xf32>
    %18 = vector.broadcast %16 : vector<1x128xf32> to vector<8x128xf32>
    %19 = arith.addf %17, %18 : vector<8x128xf32>
    %20 = math.tanh %19 : vector<8x128xf32>
    %cst_12 = arith.constant 2.000000e+00 : f32
    %21 = vector.broadcast %cst_12 : f32 to vector<8x128xf32>
    %22 = arith.mulf %21, %20 : vector<8x128xf32>
    %c0_13 = arith.constant 0 : index
    %c0_14 = arith.constant 0 : index
    %23 = vector.load %arg3[%c0_13, %c0_14] : memref<8x128xf32, #tpu.memory_space<vmem>>, vector<8x128xf32>
    tpu.vector_store %arg3[%c0_13, %c0_14], %22 {strides = array<i32>} : memref<8x128xf32, #tpu.memory_space<vmem>>, vector<8x128xf32>,
    return
  }
  func.func @transform_0(%arg0: i32) -> (i32, i32) {
    %c0_i32 = arith.constant 0 : i32
    %c0_i32_0 = arith.constant 0 : i32
    return %arg0, %c0_i32 : i32, i32
  }
  func.func @transform_1(%arg0: i32) -> (i32, i32) {
    %c0_i32 = arith.constant 0 : i32
    %c0_i32_0 = arith.constant 0 : i32
    %c0_i32_1 = arith.constant 0 : i32
    return %c0_i32, %c0_i32_0 : i32, i32
  }
  func.func @transform_2(%arg0: i32) -> (i32, i32) {
    %c0_i32 = arith.constant 0 : i32
    %c0_i32_0 = arith.constant 0 : i32
    return %arg0, %c0_i32 : i32, i32
  }
}

</mosaic_0001>

<bundles_post_ra>
// kernel: tpu_custom_call.1
= control target key start
LH: loop header
LB: loop body
LE: loop exit
PB: predicated region body
PF: predicated region fallthrough
CT: control target
= control target key end

     0   :  { %7 = vsyncpa [#allocation3], 0  ;;  %s587_s0 = inlined_call_operand.hbm [shape: f32[8,16], index: 0, kind: input, shape index: {}]   ;;  %s588_s1 = inlined_call_operand.hbm [shape: f32[296,128], index: 1, kind: input, shape index: {}]   ;;  %s589_s2 = inlined_call_operand.hbm [shape: f32[8,128], index: 2, kind: output, shape index: {}]  }
   0x1   :  { %8 = vsyncpa [#allocation6], 0 }
   0x2   :  { %9 = vsyncpa [#allocation4], 0  ;;  %s516_s9 = smov [#allocation2]   ;;  %s517_s11 = smov [#allocation5]  }
   0x3   :  { %s16_s10 = sshll.u32 %s516_s9, 4  ;;  %s25_s12 = sshll.u32 %s517_s11, 4  ;;  %s17_s10 = int_to_ptr.vmem [resolvable:$true] %s16_s10  ;;  %s26_s12 = int_to_ptr.vmem [resolvable:$true] %s25_s12 }
   0x4   :  { %s458_s13 = scalar_lea.vmem %s17_s10, 128  ;;  %p463_p1 = scmp.lt.s32.totalorder %s17_s10, %s17_s10 }
   0x5   :  { %p459_p0 = scmp.ne.s32.totalorder %s17_s10, %s458_s13  ;;  %p464_p2 = scmp.lt.s32.totalorder %s458_s13, %s458_s13 }
   0x7   :  { %p465_p3 = por %p464_p2, %p463_p1 }
   0x9   :  { %p466_p4 = pnand %p465_p3, %p459_p0 }
   0xb   :  { %469 = shalt.err (!%p466_p4)
}
   0xc   :  { %19 = dma.hbm_to_vmem [thread:$0]  %s587_s0, 128, %s17_s10, [#allocation3]  }
   0xd   :  { %s478_s16 = scalar_lea.vmem %s26_s12, 4736  ;;  %p483_p6 = scmp.lt.s32.totalorder %s26_s12, %s26_s12 }
   0xe   :  { %p479_p5 = scmp.ne.s32.totalorder %s26_s12, %s478_s16  ;;  %p484_p7 = scmp.lt.s32.totalorder %s478_s16, %s478_s16 }
  0x10   :  { %p485_p8 = por %p484_p7, %p483_p6 }
  0x12   :  { %p486_p9 = pnand %p485_p8, %p479_p5 }
  0x14   :  { %489 = shalt.err (!%p486_p9)
}
  0x15   :  { %s518_s17 = smov 128   ;;  %s519_s18 = smov 8  }
  0x16   :  { %31 = dma.hbm_to_vmem [thread:$0]  %s588_s1, 4736, %s26_s12, [#allocation6], %s518_s17, %s518_s17, %s519_s18  }
  0x17   :  { %510 = dma.done.wait [#allocation3], 128  }
  0x18   :  { %511 = vsyncadd [#allocation3], 4294967168 }
  0x19   :  { %512 = dma.done.wait [#allocation6], 4736  }
  0x1a   :  { %513 = vsyncadd [#allocation6], 4294962560  ;;  %v520_v0 = vmov 0.0   ;;  %vm521_vm0 = vmmov 0   ;;  %v40_v1 = vld [vmem:[#allocation5 + $0x8] sm:$0xff]  ;;  %v39_v2 = vld [vmem:[#allocation5] sm:$0xff] }
  0x1b   :  { %364 = vmatprep.subr.mxu0 %v520_v0  ;;  %368 = vmatprep.mubr.msk.f32.mxu0 %vm521_vm0, %v520_v0  ;;  %v38_v3 = vld [vmem:[#allocation2] sm:$0xff]  ;;  %vm46_vm1 = vcmask 130048   ;;  %v136_v4 = vld [vmem:[#allocation5 + $0x90] sm:$0xff]  ;;  %v135_v5 = vld [vmem:[#allocation5 + $0x88] sm:$0xff]  ;;  %s522_s0 = smov [#allocation7]  }
  0x1c   :  { %371 = vmatprep.subr.mxu1 %v520_v0  ;;  %403 = vmatprep.mubr.msk.f32.mxu1 %vm521_vm0, %v520_v0  ;;  %v134_v6 = vld [vmem:[#allocation5 + $0x80] sm:$0xff]  ;;  %v133_v7 = vld [vmem:[#allocation5 + $0x78] sm:$0xff]  ;;  %v132_v8 = vld [vmem:[#allocation5 + $0x70] sm:$0xff]  ;;  %s313_s1 = sshll.u32 %s522_s0, 4  ;;  %s314_s1 = int_to_ptr.vmem [resolvable:$true] %s313_s1 }
  0x1d   :  { %365 = vmatpush3.msra.mxu0 %v40_v1  ;;  %372 = vmatpush3.msra.mxu1 %v136_v4  ;;  %v131_v9 = vld [vmem:[#allocation5 + $0x68] sm:$0xff]  ;;  %v130_v10 = vld [vmem:[#allocation5 + $0x60] sm:$0xff]  ;;  %v129_v11 = vld [vmem:[#allocation5 + $0x58] sm:$0xff]  ;;  %s490_s21 = scalar_lea.vmem %s314_s1, 128  ;;  %p495_p11 = scmp.lt.s32.totalorder %s314_s1, %s314_s1 }
  0x1e   :  { %366 = vmatprep.subr.mxu0 %v520_v0  ;;  %373 = vmatprep.subr.mxu1 %v520_v0  ;;  %v128_v12 = vld [vmem:[#allocation5 + $0x50] sm:$0xff]  ;;  %v127_v13 = vld [vmem:[#allocation5 + $0x48] sm:$0xff]  ;;  %v126_v14 = vld [vmem:[#allocation5 + $0x40] sm:$0xff]  ;;  %p491_p10 = scmp.ne.s32.totalorder %s314_s1, %s490_s21  ;;  %p496_p12 = scmp.lt.s32.totalorder %s490_s21, %s490_s21 }
  0x1f   :  { %367 = vmatpush3.msra.mxu0 %v39_v2  ;;  %374 = vmatpush3.msra.mxu1 %v135_v5  ;;  %v125_v15 = vld [vmem:[#allocation5 + $0x38] sm:$0xff]  ;;  %v124_v16 = vld [vmem:[#allocation5 + $0x30] sm:$0xff]  ;;  %v123_v17 = vld [vmem:[#allocation5 + $0x28] sm:$0xff] }
  0x20   :  { %369 = vmatmul.mubr.msk.f32.vlgmr.msra.gmra.mxu0 %vm46_vm1, %v38_v3  ;;  %375 = vmatprep.subr.mxu1 %v520_v0  ;;  %v122_v18 = vld [vmem:[#allocation5 + $0x20] sm:$0xff]  ;;  %v121_v19 = vld [vmem:[#allocation5 + $0x18] sm:$0xff]  ;;  %v227_v21 = vld [vmem:[#allocation5 + $0x110] sm:$0xff]  ;;  %p497_p13 = por %p496_p12, %p495_p11 }
  0x21   :  { %406 = vmatprep.subr.mxu0 %v520_v0  ;;  %376 = vmatpush3.msra.mxu1 %v134_v6  ;;  %v228_v20 = vld [vmem:[#allocation5 + $0x118] sm:$0xff]  ;;  %v226_v22 = vld [vmem:[#allocation5 + $0x108] sm:$0xff]  ;;  %v225_v23 = vld [vmem:[#allocation5 + $0x100] sm:$0xff] }
  0x22   :  { %438 = vmatprep.mubr.msk.f32.mxu0 %vm521_vm0, %v520_v0  ;;  %377 = vmatprep.subr.mxu1 %v520_v0  ;;  %v224_v24 = vld [vmem:[#allocation5 + $0xf8] sm:$0xff]  ;;  %v223_v25 = vld [vmem:[#allocation5 + $0xf0] sm:$0xff]  ;;  %v222_v26 = vld [vmem:[#allocation5 + $0xe8] sm:$0xff]  ;;  %p498_p0 = pnand %p497_p13, %p491_p10 }
  0x23   :  { %378 = vmatpush3.msra.mxu1 %v133_v7  ;;  %407 = vmatpush3.msra.mxu0 %v228_v20  ;;  %v221_v27 = vld [vmem:[#allocation5 + $0xe0] sm:$0xff]  ;;  %v220_v28 = vld [vmem:[#allocation5 + $0xd8] sm:$0xff]  ;;  %v219_v29 = vld [vmem:[#allocation5 + $0xd0] sm:$0xff] }
  0x24   :  { %379 = vmatprep.subr.mxu1 %v520_v0  ;;  %408 = vmatprep.subr.mxu0 %v520_v0  ;;  %v218_v30 = vld [vmem:[#allocation5 + $0xc8] sm:$0xff]  ;;  %v217_v31 = vld [vmem:[#allocation5 + $0xc0] sm:$0xff]  ;;  %v216_v32 = vld [vmem:[#allocation5 + $0xb8] sm:$0xff] }
  0x25   :  { %380 = vmatpush3.msra.mxu1 %v132_v8  ;;  %409 = vmatpush3.msra.mxu0 %v227_v21  ;;  %v323_v33 = vld [vmem:[#allocation5 + $0x10] ss:$0 sm:$0xff]  ;;  %v214_v39 = vld [vmem:[#allocation5 + $0xa8] sm:$0xff]  ;;  %v213_v40 = vld [vmem:[#allocation5 + $0xa0] sm:$0xff] }
  0x26   :  { %381 = vmatprep.subr.mxu1 %v520_v0  ;;  %410 = vmatprep.subr.mxu0 %v520_v0  ;;  %v215_v38 = vld [vmem:[#allocation5 + $0xb0] sm:$0xff]  ;;  %v325_v41 = vld [vmem:[#allocation5 + $0x98] ss:$0 sm:$0xff]  ;;  %v326_v46 = vld [vmem:[#allocation5 + $0x120] ss:$0 sm:$0xff] }
  0x27   :  { %382 = vmatpush3.msra.mxu1 %v131_v9  ;;  %411 = vmatpush3.msra.mxu0 %v226_v22 }
  0x28   :  { %383 = vmatprep.subr.mxu1 %v520_v0  ;;  %412 = vmatprep.subr.mxu0 %v520_v0 }
  0x29   :  { %384 = vmatpush3.msra.mxu1 %v130_v10  ;;  %413 = vmatpush3.msra.mxu0 %v225_v23 }
  0x2a   :  { %385 = vmatprep.subr.mxu1 %v520_v0  ;;  %414 = vmatprep.subr.mxu0 %v520_v0 }
  0x2b   :  { %386 = vmatpush3.msra.mxu1 %v129_v11  ;;  %415 = vmatpush3.msra.mxu0 %v224_v24 }
  0x2c   :  { %387 = vmatprep.subr.mxu1 %v520_v0  ;;  %416 = vmatprep.subr.mxu0 %v520_v0 }
  0x2d   :  { %388 = vmatpush3.msra.mxu1 %v128_v12  ;;  %417 = vmatpush3.msra.mxu0 %v223_v25 }
  0x2e   :  { %389 = vmatprep.subr.mxu1 %v520_v0  ;;  %418 = vmatprep.subr.mxu0 %v520_v0 }
  0x2f   :  { %390 = vmatpush3.msra.mxu1 %v127_v13  ;;  %419 = vmatpush3.msra.mxu0 %v222_v26 }
  0x30   :  { %391 = vmatprep.subr.mxu1 %v520_v0  ;;  %420 = vmatprep.subr.mxu0 %v520_v0 }
  0x31   :  { %392 = vmatpush3.msra.mxu1 %v126_v14  ;;  %421 = vmatpush3.msra.mxu0 %v221_v27 }
  0x32   :  { %393 = vmatprep.subr.mxu1 %v520_v0  ;;  %422 = vmatprep.subr.mxu0 %v520_v0 }
  0x33   :  { %394 = vmatpush3.msra.mxu1 %v125_v15  ;;  %423 = vmatpush3.msra.mxu0 %v220_v28 }
  0x34   :  { %395 = vmatprep.subr.mxu1 %v520_v0  ;;  %424 = vmatprep.subr.mxu0 %v520_v0 }
  0x35   :  { %396 = vmatpush3.msra.mxu1 %v124_v16  ;;  %425 = vmatpush3.msra.mxu0 %v219_v29 }
  0x36   :  { %397 = vmatprep.subr.mxu1 %v520_v0  ;;  %426 = vmatprep.subr.mxu0 %v520_v0 }
  0x37   :  { %398 = vmatpush3.msra.mxu1 %v123_v17  ;;  %427 = vmatpush3.msra.mxu0 %v218_v30 }
  0x38   :  { %399 = vmatprep.subr.mxu1 %v520_v0  ;;  %428 = vmatprep.subr.mxu0 %v520_v0 }
  0x39   :  { %400 = vmatpush3.msra.mxu1 %v122_v18  ;;  %429 = vmatpush3.msra.mxu0 %v217_v31 }
  0x3a   :  { %401 = vmatprep.subr.mxu1 %v520_v0  ;;  %430 = vmatprep.subr.mxu0 %v520_v0 }
  0x3b   :  { %402 = vmatpush3.msra.mxu1 %v121_v19  ;;  %431 = vmatpush3.msra.mxu0 %v216_v32 }
  0x3c   :  { %432 = vmatprep.subr.mxu0 %v520_v0 }
  0x3d   :  { %433 = vmatpush3.msra.mxu0 %v215_v38 }
  0x3e   :  { %434 = vmatprep.subr.mxu0 %v520_v0 }
  0x3f   :  { %435 = vmatpush3.msra.mxu0 %v214_v39 }
  0x40   :  { %436 = vmatprep.subr.mxu0 %v520_v0 }
  0x41   :  { %437 = vmatpush3.msra.mxu0 %v213_v40 }
  0xe0   :  { %v116_v34 = vpop.f32.mrf.mxu0 }
  0xe1   :  { %v117_v35 = vadd.f32 %v323_v33, %v116_v34 }
  0xe2   :  { %v370_v36 = vpop.f32.mrf.mxu0 }
  0xe3   :  { %v120_v37 = vmax.f32 %v117_v35, 0.0 }
  0xe5   :  { %404 = vmatmul.mubr.f32.vlgmr.msra.gmra.mxu1 %v120_v37 }
 0x1a5   :  { %v208_v42 = vpop.f32.mrf.mxu1 }
 0x1a6   :  { %v209_v43 = vadd.f32 %v325_v41, %v208_v42 }
 0x1a7   :  { %v405_v44 = vpop.f32.mrf.mxu1 }
 0x1a8   :  { %v212_v45 = vmax.f32 %v209_v43, 0.0 }
 0x1aa   :  { %439 = vmatmul.mubr.f32.vlgmr.msra.gmra.mxu0 %v212_v45 }
 0x26a   :  { %v300_v47 = vpop.f32.mrf.mxu0 }
 0x26b   :  { %v301_v48 = vadd.f32 %v326_v46, %v300_v47 }
 0x26c   :  { %v440_v49 = vpop.f32.mrf.mxu0 }
 0x26d   :  { %448 = vtanh.f32 %v301_v48 }
 0x27a   :  { %v449_v50 = vpop.eup %448 }
 0x27b   :  { %v305_v51 = vmul.f32 2.0, %v449_v50 }
 0x27d   :  { %306 = vst [vmem:[#allocation7] sm:$0xff] %v305_v51 }
 0x27e   :  { %501 = shalt.err (!%p498_p0)
}
 0x27f   :  { %316 = dma.vmem_to_hbm [thread:$0]  %s314_s1, 128, %s589_s2, [#allocation4]  }
 0x280   :  { %514 = dma.done.wait [#allocation4], 128  }
 0x281   :  { %515 = vsyncadd [#allocation4], 4294967168 }
 0x282   :  { %320 = vsyncpa [#allocation3], 1 }
 0x283   :  { %321 = vsyncpa [#allocation6], 1 }
 0x284   :  { %322 = vsyncpa [#allocation4], 1 }

</bundles_post_ra>
